<compile_context>
chip_gen: v7x
topology: tpu7x:2x2x1
jax: 0.10.0
libtpu: 0.0.40
codegen_flags: <defaults>
</compile_context>

<pallas_src>
import jax
import jax.numpy as jnp
from jax.experimental import pallas as pl
from jax.experimental.pallas import tpu as pltpu


def upsample_conv_kernel(xp_ref, g_ref, bias_ref, o_ref):
    # xp_ref  : (1, H+2, W*C)      row-padded NHWC input, (W, C) flattened onto lanes
    # g_ref   : (K_pad, 4*W*C)     folded sub-pixel conv weights (VMEM-resident, DMA'd once)
    # bias_ref: (1, 4*W*C)         bias tiled over (py, c, px) lane order
    # o_ref   : (1, H, 4*W*C)      both output parities of all rows for this batch element
    H = o_ref.shape[1]
    WC = xp_ref.shape[2]
    K_pad = g_ref.shape[0]

    # Row-im2col: three static slices (starts 0/1/2) concatenated onto the lane axis,
    # zero-padded so K is 128-aligned (256 here -> MXU-native on v6e/v7x, aligned on v5e).
    pieces = [xp_ref[0, 0:H, :], xp_ref[0, 1:H + 1, :], xp_ref[0, 2:H + 2, :]]
    if K_pad > 3 * WC:
        pieces.append(jnp.zeros((H, K_pad - 3 * WC), xp_ref.dtype))
    s = jnp.concatenate(pieces, axis=-1)                       # (H, K_pad)

    acc = jnp.dot(s, g_ref[...], preferred_element_type=jnp.float32)   # (H, 4*W*C)
    o_ref[0] = (acc + bias_ref[...]).astype(o_ref.dtype)       # one contiguous 256-lane store


def _fold_weights(w_oihw):
    """(Cout, Cin, 3, 3) -> W22[py, ry, px, rx, cin, cout]: 2x2 sub-pixel taps."""
    W3 = jnp.transpose(w_oihw, (2, 3, 1, 0))                   # (dy, dx, cin, cout)
    Wr = jnp.stack([
        jnp.stack([W3[0], W3[1] + W3[2]], axis=0),             # py = 0
        jnp.stack([W3[0] + W3[1], W3[2]], axis=0),             # py = 1
    ], axis=0)                                                 # (py, ry, dx, cin, cout)
    W22 = jnp.stack([
        jnp.stack([Wr[:, :, 0], Wr[:, :, 1] + Wr[:, :, 2]], axis=2),   # px = 0
        jnp.stack([Wr[:, :, 0] + Wr[:, :, 1], Wr[:, :, 2]], axis=2),   # px = 1
    ], axis=2)                                                 # (py, ry, px, rx, cin, cout)
    return W22


def _build_g(W22, W, C, K_pad):
    """Scatter-free banded weight build (no Python .at[].set loops).

    G[ryy*W*C + cu*C + cin, ((py*W + c)*2 + px)*C + cout]
        = sum_{ry,rx} [py+ry == ryy] * [cu == c+px+rx-1] * W22[py,ry,px,rx,cin,cout]
    Out-of-range columns (c+px+rx-1 outside [0,W)) get zero -> column zero-pad is absorbed.
    """
    dt = W22.dtype
    py = jnp.arange(2); ry = jnp.arange(2); ryy = jnp.arange(3)
    R = (py[:, None, None] + ry[None, :, None] == ryy[None, None, :]).astype(dt)   # (py,ry,ryy)
    cu = jnp.arange(W); cc = jnp.arange(W); px = jnp.arange(2); rx = jnp.arange(2)
    Scol = (cu[None, None, :, None] ==
            cc[None, None, None, :] + px[:, None, None, None]
            + rx[None, :, None, None] - 1).astype(dt)                              # (px,rx,cu,c)
    G7 = jnp.einsum('ayt,pxuc,aypxio->tuiacpo', R, Scol, W22)   # (ryy,cu,cin,py,c,px,cout)
    G = G7.reshape(3 * W * C, 2 * W * 2 * C)
    if K_pad > 3 * W * C:
        G = jnp.pad(G, ((0, K_pad - 3 * W * C), (0, 0)))
    return G


@jax.jit
def upsample_forward(x_nchw, w_oihw, b):
    """Forward pass of UpSample: nearest 2x upsample followed by 3x3 same conv."""
    N, C, H, W = x_nchw.shape
    WC = W * C
    out_lanes = 2 * W * 2 * C                      # (py, c, px, cout) lane order = 256 here
    K_pad = ((3 * WC + 127) // 128) * 128          # 192 -> 256

    # --- input layout (fuses into one input-sized pass): NCHW -> NHWC, flatten (W,C)
    #     onto lanes, zero-pad ROWS by 1 (column pad is absorbed into G).
    x = jnp.transpose(x_nchw, (0, 2, 3, 1)).reshape(N, H, WC)
    xp = jnp.pad(x, ((0, 0), (1, 1), (0, 0)))      # (N, H+2, W*C)

    # --- weight-only data (in a real model: precompute once per weight update).
    W22 = _fold_weights(w_oihw.astype(jnp.float32))
    G = _build_g(W22, W, C, K_pad)                                # (K_pad, out_lanes)
    bias = jnp.tile(b.astype(jnp.float32), 2 * W * 2)[None, :]    # (1, out_lanes)

    out = pl.pallas_call(
        upsample_conv_kernel,
        out_shape=jax.ShapeDtypeStruct((N, H, out_lanes), x_nchw.dtype),
        grid=(N,),                                  # one step per batch element
        in_specs=[
            pl.BlockSpec((1, H + 2, WC), lambda n: (n, 0, 0)),
            pl.BlockSpec((K_pad, out_lanes), lambda n: (0, 0)),   # constant -> VMEM-resident
            pl.BlockSpec((1, out_lanes), lambda n: (0, 0)),       # constant -> VMEM-resident
        ],
        out_specs=pl.BlockSpec((1, H, out_lanes), lambda n: (n, 0, 0)),
        compiler_params=pltpu.CompilerParams(dimension_semantics=("parallel",)),
    )(xp, G, bias)

    # --- depth-to-space is a FREE reshape: (N, H, 256) is already NHWC of the 2x image.
    out_nhwc = out.reshape(N, 2 * H, 2 * W, C)
    # Final NHWC -> NCHW only to match the PyTorch layout (drop if consumer takes NHWC).
    return jnp.transpose(out_nhwc, (0, 3, 1, 2))


def reference_forward(x_nchw, w_oihw, b):
    """Pure-JAX reference (matches PyTorch semantics) for verification."""
    N, C, H, W = x_nchw.shape
    up = jnp.repeat(jnp.repeat(x_nchw, 2, axis=2), 2, axis=3)
    out = jax.lax.conv_general_dilated(
        up, w_oihw, window_strides=(1, 1), padding=((1, 1), (1, 1)),
        dimension_numbers=('NCHW', 'OIHW', 'NCHW'))
    return out + b.reshape(1, C, 1, 1)


if __name__ == "__main__":
    key = jax.random.PRNGKey(0)
    k1, k2, k3 = jax.random.split(key, 3)

    # Small shapes consistent with the module: batch=2, channels=4, spatial=16
    N, C, H, W = 2, 4, 16, 16
    x = jax.random.normal(k1, (N, C, H, W), jnp.float32)

    # Conv2d(C, C, 3) parameters: weight (C, C, 3, 3), bias (C,)
    fan_in = C * 3 * 3
    w = jax.random.normal(k2, (C, C, 3, 3), jnp.float32) / jnp.sqrt(fan_in)
    b = jax.random.normal(k3, (C,), jnp.float32) * 0.05

    out = jax.block_until_ready(upsample_forward(x, w, b))

    ref = reference_forward(x, w, b)
    assert out.shape == (N, C, 2 * H, 2 * W), out.shape
    max_err = float(jnp.max(jnp.abs(out - ref)))
    assert jnp.allclose(out, ref, atol=1e-3, rtol=1e-3), f"max abs err = {max_err}"

    print("KERNEL_OK")
</pallas_src>

<mosaic_0001>
module attributes {stable_mosaic.version = 11 : i64} {
  func.func @upsample_conv_kernel(%arg0: i32, %arg1: memref<1x18x64xf32, #tpu.memory_space<vmem>>, %arg2: memref<256x256xf32, #tpu.memory_space<vmem>>, %arg3: memref<1x256xf32, #tpu.memory_space<vmem>>, %arg4: memref<1x16x256xf32, #tpu.memory_space<vmem>>) attributes {dimension_semantics = [#tpu.dimension_semantics<parallel>], iteration_bounds = array<i64: 2>, scalar_prefetch = 0 : i64, scratch_operands = 0 : i64, tpu.core_type = #tpu.core_type<tc>, window_params = [{transform_indices = @transform_0, window_bounds = array<i64: 1, 18, 64>}, {pipeline_mode = #tpu.pipeline_mode<synchronous>, transform_indices = @transform_1, window_bounds = array<i64: 256, 256>}, {pipeline_mode = #tpu.pipeline_mode<synchronous>, transform_indices = @transform_2, window_bounds = array<i64: 1, 256>}, {transform_indices = @transform_3, window_bounds = array<i64: 1, 16, 256>}]} {
    %c0 = arith.constant 0 : index
    %c0_0 = arith.constant 0 : index
    %c0_1 = arith.constant 0 : index
    %0 = vector.load %arg1[%c0, %c0_0, %c0_1] : memref<1x18x64xf32, #tpu.memory_space<vmem>>, vector<1x16x64xf32>
    %1 = vector.shape_cast %0 : vector<1x16x64xf32> to vector<16x64xf32>
    %c0_2 = arith.constant 0 : index
    %c1 = arith.constant 1 : index
    %c0_3 = arith.constant 0 : index
    %2 = vector.load %arg1[%c0_2, %c1, %c0_3] : memref<1x18x64xf32, #tpu.memory_space<vmem>>, vector<1x16x64xf32>
    %3 = vector.shape_cast %2 : vector<1x16x64xf32> to vector<16x64xf32>
    %c0_4 = arith.constant 0 : index
    %c2 = arith.constant 2 : index
    %c0_5 = arith.constant 0 : index
    %4 = vector.load %arg1[%c0_4, %c2, %c0_5] : memref<1x18x64xf32, #tpu.memory_space<vmem>>, vector<1x16x64xf32>
    %5 = vector.shape_cast %4 : vector<1x16x64xf32> to vector<16x64xf32>
    %cst = arith.constant 0.000000e+00 : f32
    %6 = vector.broadcast %cst : f32 to vector<16x64xf32>
    %7 = tpu.concatenate %1, %3, %5, %6 in 1 : vector<16x64xf32>, vector<16x64xf32>, vector<16x64xf32>, vector<16x64xf32> -> vector<16x256xf32>
    %c0_6 = arith.constant 0 : index
    %c0_7 = arith.constant 0 : index
    %8 = vector.load %arg2[%c0_6, %c0_7] : memref<256x256xf32, #tpu.memory_space<vmem>>, vector<256x256xf32>
    %cst_8 = arith.constant dense<0.000000e+00> : vector<16x256xf32>
    %9 = tpu.matmul %7, %8, %cst_8 {dimension_numbers = #tpu.dot_dimension_numbers<[1], [0], [0], [1], [0, 0, 1, 1], [], []>} : vector<16x256xf32>, vector<256x256xf32>, vector<16x256xf32> -> vector<16x256xf32>
    %c0_9 = arith.constant 0 : index
    %c0_10 = arith.constant 0 : index
    %10 = vector.load %arg3[%c0_9, %c0_10] : memref<1x256xf32, #tpu.memory_space<vmem>>, vector<1x256xf32>
    %11 = vector.broadcast %10 : vector<1x256xf32> to vector<16x256xf32>
    %12 = arith.addf %9, %11 : vector<16x256xf32>
    %c0_11 = arith.constant 0 : index
    %c0_12 = arith.constant 0 : index
    %c0_13 = arith.constant 0 : index
    %13 = vector.load %arg4[%c0_11, %c0_12, %c0_13] : memref<1x16x256xf32, #tpu.memory_space<vmem>>, vector<1x16x256xf32>
    %14 = vector.shape_cast %13 : vector<1x16x256xf32> to vector<16x256xf32>
    %15 = vector.shape_cast %12 : vector<16x256xf32> to vector<1x16x256xf32>
    tpu.vector_store %arg4[%c0_11, %c0_12, %c0_13], %15 {strides = array<i32>} : memref<1x16x256xf32, #tpu.memory_space<vmem>>, vector<1x16x256xf32>,
    return
  }
  func.func @transform_0(%arg0: i32) -> (i32, i32, i32) {
    %c0_i32 = arith.constant 0 : i32
    %c0_i32_0 = arith.constant 0 : i32
    %c0_i32_1 = arith.constant 0 : i32
    return %arg0, %c0_i32, %c0_i32_0 : i32, i32, i32
  }
  func.func @transform_1(%arg0: i32) -> (i32, i32) {
    %c0_i32 = arith.constant 0 : i32
    %c0_i32_0 = arith.constant 0 : i32
    %c0_i32_1 = arith.constant 0 : i32
    return %c0_i32, %c0_i32_0 : i32, i32
  }
  func.func @transform_2(%arg0: i32) -> (i32, i32) {
    %c0_i32 = arith.constant 0 : i32
    %c0_i32_0 = arith.constant 0 : i32
    %c0_i32_1 = arith.constant 0 : i32
    return %c0_i32, %c0_i32_0 : i32, i32
  }
  func.func @transform_3(%arg0: i32) -> (i32, i32, i32) {
    %c0_i32 = arith.constant 0 : i32
    %c0_i32_0 = arith.constant 0 : i32
    %c0_i32_1 = arith.constant 0 : i32
    return %arg0, %c0_i32, %c0_i32_0 : i32, i32, i32
  }
}

</mosaic_0001>

<bundles_post_ra>
// kernel: tile.8
= control target key start
LH: loop header
LB: loop body
LE: loop exit
PB: predicated region body
PF: predicated region fallthrough
CT: control target
= control target key end

     0   :  { %s64_s0 = inlined_call_operand.vmem [shape: f32[4], index: 0, kind: input, shape index: {}]   ;;  %s65_s1 = inlined_call_operand.vmem [shape: f32[64,4], index: 1, kind: output, shape index: {}]  }
   0x1   :  { %v4_v0 = vld [vmem:[%s64_s0] ss:$0 sm:$0xff] }
   0x2   :  { %5 = vst [vmem:[%s65_s1] sm:$0xff] %v4_v0  ;;  %20 = vst [vmem:[%s65_s1 + $0x8] sm:$0xff] %v4_v0 }
   0x3   :  { %21 = vst [vmem:[%s65_s1 + $0x10] sm:$0xff] %v4_v0  ;;  %22 = vst [vmem:[%s65_s1 + $0x18] sm:$0xff] %v4_v0 }
   0x4   :  { %23 = vst [vmem:[%s65_s1 + $0x20] sm:$0xff] %v4_v0  ;;  %24 = vst [vmem:[%s65_s1 + $0x28] sm:$0xff] %v4_v0 }
   0x5   :  { %25 = vst [vmem:[%s65_s1 + $0x30] sm:$0xff] %v4_v0  ;;  %26 = vst [vmem:[%s65_s1 + $0x38] sm:$0xff] %v4_v0 }

// kernel: tile.9
= control target key start
LH: loop header
LB: loop body
LE: loop exit
PB: predicated region body
PF: predicated region fallthrough
CT: control target
= control target key end

     0   :  { %vm5_vm0 = vcmask 1041409   ;;  %s425_s14 = smov 124   ;;  %s426_s21 = smov 116   ;;  %vm7_vm1 = vcmask 31744   ;;  %vm17_vm2 = vcmask 1048544   ;;  %vm27_vm3 = vcmask 1015744   ;;  %s696_s0 = inlined_call_operand.vmem [shape: f32[64,4], index: 0, kind: input, shape index: {}]   ;;  %s697_s1 = inlined_call_operand.vmem [shape: f32[1,256], index: 1, kind: output, shape index: {}]  }
   0x1   :  { %v331_v0 = vld [vmem:[%s696_s0 + $0x1f] sm:$0x1]   ;;  %v335_v3 = vld [vmem:[%s696_s0 + $0x1d] sm:$0x1]   ;;  %v333_v6 = vld [vmem:[%s696_s0 + $0x1e] sm:$0x1]  }
   0x2   :  { %v332_v1 = vld [vmem:[%s696_s0 + $0x3e] sm:$0x2]   ;;  %v336_v4 = vld [vmem:[%s696_s0 + $0x3c] sm:$0x2]   ;;  %v334_v7 = vld [vmem:[%s696_s0 + $0x3d] sm:$0x2]  }
   0x3   :  { %v14_v2 = vsel %vm5_vm0, %v332_v1, %v331_v0  ;;  %v34_v5 = vsel %vm5_vm0, %v336_v4, %v335_v3  ;;  %v337_v8 = vld [vmem:[%s696_s0 + $0x1c] sm:$0x1]   ;;  %v24_v9 = vsel %vm5_vm0, %v334_v7, %v333_v6  ;;  %v339_v12 = vld [vmem:[%s696_s0 + $0x1b] sm:$0x1]   ;;  %v341_v14 = vld [vmem:[%s696_s0 + $0x1a] sm:$0x1]  }
   0x4   :  { %15 = vrot.lane.b32.xlu0 %v14_v2, %s425_s14  ;;  %35 = vrot.lane.b32.xlu1 %v34_v5, %s426_s21  ;;  %v338_v10 = vld [vmem:[%s696_s0 + $0x3b] sm:$0x2]   ;;  %v340_v13 = vld [vmem:[%s696_s0 + $0x3a] sm:$0x2]   ;;  %s427_s3 = smov 120   ;;  %s428_s4 = smov 112  }
   0x5   :  { %v44_v11 = vsel %vm5_vm0, %v338_v10, %v337_v8  ;;  %v342_v15 = vld [vmem:[%s696_s0 + $0x39] sm:$0x2]   ;;  %v54_v16 = vsel %vm5_vm0, %v340_v13, %v339_v12  ;;  %v343_v18 = vld [vmem:[%s696_s0 + $0x19] sm:$0x1]   ;;  %v345_v20 = vld [vmem:[%s696_s0 + $0x18] sm:$0x1]  }
   0x6   :  { %v64_v17 = vsel %vm5_vm0, %v342_v15, %v341_v14  ;;  %v344_v19 = vld [vmem:[%s696_s0 + $0x38] sm:$0x2]   ;;  %v346_v21 = vld [vmem:[%s696_s0 + $0x37] sm:$0x2]   ;;  %s429_s13 = smov 108   ;;  %s430_s14 = smov 104  }
   0x7   :  { %v74_v22 = vsel %vm5_vm0, %v344_v19, %v343_v18  ;;  %v84_v23 = vsel %vm5_vm0, %v346_v21, %v345_v20  ;;  %v347_v24 = vld [vmem:[%s696_s0 + $0x17] sm:$0x1]   ;;  %v349_v26 = vld [vmem:[%s696_s0 + $0x16] sm:$0x1]   ;;  %s431_s23 = smov 100   ;;  %s432_s24 = smov 96  }
   0x8   :  { %25 = vrot.lane.b32.xlu0 %v24_v9, %s427_s3  ;;  %45 = vrot.lane.b32.xlu1 %v44_v11, %s428_s4  ;;  %v348_v25 = vld [vmem:[%s696_s0 + $0x36] sm:$0x2]   ;;  %v350_v27 = vld [vmem:[%s696_s0 + $0x35] sm:$0x2]   ;;  %s433_s4 = smov 92   ;;  %s434_s5 = smov 88  }
   0x9   :  { %v94_v28 = vsel %vm5_vm0, %v348_v25, %v347_v24  ;;  %v104_v29 = vsel %vm5_vm0, %v350_v27, %v349_v26  ;;  %v351_v30 = vld [vmem:[%s696_s0 + $0x15] sm:$0x1]   ;;  %v353_v32 = vld [vmem:[%s696_s0 + $0x14] sm:$0x1]   ;;  %v355_v36 = vld [vmem:[%s696_s0 + $0x13] sm:$0x1]  }
   0xa   :  { %v352_v31 = vld [vmem:[%s696_s0 + $0x34] sm:$0x2]   ;;  %v354_v33 = vld [vmem:[%s696_s0 + $0x33] sm:$0x2]   ;;  %v356_v37 = vld [vmem:[%s696_s0 + $0x32] sm:$0x2]  }
   0xb   :  { %v114_v34 = vsel %vm5_vm0, %v352_v31, %v351_v30  ;;  %v124_v35 = vsel %vm5_vm0, %v354_v33, %v353_v32  ;;  %v357_v38 = vld [vmem:[%s696_s0 + $0x12] sm:$0x1]   ;;  %s436_s15 = smov 80   ;;  %v134_v40 = vsel %vm5_vm0, %v356_v37, %v355_v36  ;;  %v359_v42 = vld [vmem:[%s696_s0 + $0x11] sm:$0x1]   ;;  %s438_s29 = smov 72  }
   0xc   :  { %55 = vrot.lane.b32.xlu0 %v54_v16, %s429_s13  ;;  %65 = vrot.lane.b32.xlu1 %v64_v17, %s430_s14  ;;  %v358_v39 = vld [vmem:[%s696_s0 + $0x31] sm:$0x2]   ;;  %s435_s14 = smov 84   ;;  %v360_v43 = vld [vmem:[%s696_s0 + $0x30] sm:$0x2]   ;;  %s439_s9 = smov 68  }
   0xd   :  { %v144_v41 = vsel %vm5_vm0, %v358_v39, %v357_v38  ;;  %v361_v44 = vld [vmem:[%s696_s0 + $0x10] sm:$0x1]   ;;  %v2_v46 = vld [vmem:[%s696_s0] sm:$0x1]   ;;  %v154_v48 = vsel %vm5_vm0, %v360_v43, %v359_v42  ;;  %v363_v51 = vld [vmem:[%s696_s0 + $0xf] sm:$0x1]  }
   0xe   :  { %v362_v45 = vld [vmem:[%s696_s0 + $0x2f] sm:$0x2]   ;;  %v330_v47 = vld [vmem:[%s696_s0 + $0x1f] sm:$0x2]   ;;  %v364_v52 = vld [vmem:[%s696_s0 + $0x2e] sm:$0x2]  }
   0xf   :  { %v6_v49 = vsel %vm5_vm0, %v330_v47, %v2_v46  ;;  %v164_v50 = vsel %vm5_vm0, %v362_v45, %v361_v44  ;;  %v365_v53 = vld [vmem:[%s696_s0 + $0xe] sm:$0x1]   ;;  %s440_s10 = smov 64   ;;  %v174_v55 = vsel %vm5_vm0, %v364_v52, %v363_v51  ;;  %v367_v57 = vld [vmem:[%s696_s0 + $0xd] sm:$0x1]   ;;  %s441_s19 = smov 60  }
  0x10   :  { %75 = vrot.lane.b32.xlu0 %v74_v22, %s431_s23  ;;  %85 = vrot.lane.b32.xlu1 %v84_v23, %s432_s24  ;;  %s437_s24 = smov 76   ;;  %8 = vst.msk [vmem:[#allocation0] ss:$8 sm:$0x3] %vm7_vm1, %v6_v49   ;;  %v366_v54 = vld [vmem:[%s696_s0 + $0x2d] sm:$0x2]  }
  0x11   :  { %v184_v56 = vsel %vm5_vm0, %v366_v54, %v365_v53  ;;  %v368_v58 = vld [vmem:[%s696_s0 + $0x2c] sm:$0x2]   ;;  %v369_v59 = vld [vmem:[%s696_s0 + $0xc] sm:$0x1]   ;;  %s442_s20 = smov 56   ;;  %s444_s30 = smov 48  }
  0x12   :  { %v370_v60 = vld [vmem:[%s696_s0 + $0x2b] sm:$0x2]   ;;  %v194_v61 = vsel %vm5_vm0, %v368_v58, %v367_v57  ;;  %v371_v63 = vld [vmem:[%s696_s0 + $0xb] sm:$0x1]   ;;  %v373_v1 = vld [vmem:[%s696_s0 + $0xa] sm:$0x1]  }
  0x13   :  { %v204_v62 = vsel %vm5_vm0, %v370_v60, %v369_v59  ;;  %v372_v0 = vld [vmem:[%s696_s0 + $0x2a] sm:$0x2]   ;;  %v374_v2 = vld [vmem:[%s696_s0 + $0x29] sm:$0x2]   ;;  %v375_v5 = vld [vmem:[%s696_s0 + $0x9] sm:$0x1]  }
  0x14   :  { %95 = vrot.lane.b32.xlu0 %v94_v28, %s433_s4  ;;  %105 = vrot.lane.b32.xlu1 %v104_v29, %s434_s5  ;;  %v214_v3 = vsel %vm5_vm0, %v372_v0, %v371_v63  ;;  %v224_v4 = vsel %vm5_vm0, %v374_v2, %v373_v1  ;;  %v376_v6 = vld [vmem:[%s696_s0 + $0x28] sm:$0x2]   ;;  %v377_v7 = vld [vmem:[%s696_s0 + $0x8] sm:$0x1]   ;;  %s446_s11 = smov 40   ;;  %s448_s21 = smov 32  }
  0x15   :  { %v378_v8 = vld [vmem:[%s696_s0 + $0x27] sm:$0x2]   ;;  %v234_v9 = vsel %vm5_vm0, %v376_v6, %v375_v5  ;;  %v379_v11 = vld [vmem:[%s696_s0 + $0x7] sm:$0x1]   ;;  %v381_v13 = vld [vmem:[%s696_s0 + $0x6] sm:$0x1]  }
  0x16   :  { %v244_v10 = vsel %vm5_vm0, %v378_v8, %v377_v7  ;;  %v380_v12 = vld [vmem:[%s696_s0 + $0x26] sm:$0x2]   ;;  %v382_v14 = vld [vmem:[%s696_s0 + $0x25] sm:$0x2]   ;;  %v383_v17 = vld [vmem:[%s696_s0 + $0x5] sm:$0x1]  }
  0x17   :  { %v254_v15 = vsel %vm5_vm0, %v380_v12, %v379_v11  ;;  %v264_v16 = vsel %vm5_vm0, %v382_v14, %v381_v13  ;;  %v384_v18 = vld [vmem:[%s696_s0 + $0x24] sm:$0x2]   ;;  %v385_v19 = vld [vmem:[%s696_s0 + $0x4] sm:$0x1]   ;;  %s450_s2 = smov 24   ;;  %s452_s12 = smov 16  }
  0x18   :  { %115 = vrot.lane.b32.xlu0 %v114_v34, %s435_s14  ;;  %125 = vrot.lane.b32.xlu1 %v124_v35, %s436_s15  ;;  %v386_v20 = vld [vmem:[%s696_s0 + $0x23] sm:$0x2]   ;;  %v274_v21 = vsel %vm5_vm0, %v384_v18, %v383_v17  ;;  %v387_v23 = vld [vmem:[%s696_s0 + $0x3] sm:$0x1]   ;;  %s454_s17 = smov 8   ;;  %s455_s18 = smov 4  }
  0x19   :  { %v284_v22 = vsel %vm5_vm0, %v386_v20, %v385_v19  ;;  %v388_v24 = vld [vmem:[%s696_s0 + $0x22] sm:$0x2]   ;;  %v389_v25 = vld [vmem:[%s696_s0 + $0x2] sm:$0x1]   ;;  %v391_v29 = vld [vmem:[%s696_s0 + $0x1] sm:$0x1]  }
  0x1a   :  { %v390_v26 = vld [vmem:[%s696_s0 + $0x21] sm:$0x2]   ;;  %v294_v27 = vsel %vm5_vm0, %v388_v24, %v387_v23  ;;  %v392_v30 = vld [vmem:[%s696_s0 + $0x20] sm:$0x2]   ;;  %s453_s0 = smov 12   ;;  %vm37_vm4 = vcmask 982944  }
  0x1b   :  { %v304_v28 = vsel %vm5_vm0, %v390_v26, %v389_v25  ;;  %v314_v31 = vsel %vm5_vm0, %v392_v30, %v391_v29  ;;  %vm47_vm5 = vcmask 950144   ;;  %vm57_vm6 = vcmask 917344  }
  0x1c   :  { %135 = vrot.lane.b32.xlu0 %v134_v40, %s437_s24  ;;  %145 = vrot.lane.b32.xlu1 %v144_v41, %s438_s29  ;;  %s443_s29 = smov 52   ;;  %vm67_vm7 = vcmask 884544   ;;  %vm77_vm8 = vcmask 851744   ;;  %vm87_vm9 = vcmask 818944   ;;  %vm97_vm10 = vcmask 786144  }
  0x1d   :  { %vm107_vm11 = vcmask 753344   ;;  %vm117_vm12 = vcmask 720544   ;;  %vm127_vm13 = vcmask 687744   ;;  %vm137_vm14 = vcmask 654944  }
  0x1e   :  { %vm147_vm15 = vcmask 622144   ;;  %vm157_vm0 = vcmask 589344   ;;  %vm167_vm1 = vcmask 556544  }
  0x20   :  { %155 = vrot.lane.b32.xlu0 %v154_v48, %s439_s9  ;;  %165 = vrot.lane.b32.xlu1 %v164_v50, %s440_s10  ;;  %s445_s10 = smov 44  }
  0x24   :  { %175 = vrot.lane.b32.xlu0 %v174_v55, %s441_s19  ;;  %185 = vrot.lane.b32.xlu1 %v184_v56, %s442_s20  ;;  %s447_s20 = smov 36  }
  0x28   :  { %195 = vrot.lane.b32.xlu0 %v194_v61, %s443_s29  ;;  %205 = vrot.lane.b32.xlu1 %v204_v62, %s444_s30  ;;  %s449_s30 = smov 28  }
  0x2c   :  { %215 = vrot.lane.b32.xlu0 %v214_v3, %s445_s10  ;;  %225 = vrot.lane.b32.xlu1 %v224_v4, %s446_s11  ;;  %s451_s11 = smov 20  }
  0x30   :  { %235 = vrot.lane.b32.xlu0 %v234_v9, %s447_s20  ;;  %245 = vrot.lane.b32.xlu1 %v244_v10, %s448_s21 }
  0x34   :  { %255 = vrot.lane.b32.xlu0 %v254_v15, %s449_s30  ;;  %265 = vrot.lane.b32.xlu1 %v264_v16, %s450_s2 }
  0x38   :  { %275 = vrot.lane.b32.xlu0 %v274_v21, %s451_s11  ;;  %285 = vrot.lane.b32.xlu1 %v284_v22, %s452_s12 }
  0x3c   :  { %295 = vrot.lane.b32.xlu0 %v294_v27, %s453_s0  ;;  %305 = vrot.lane.b32.xlu1 %v304_v28, %s454_s17 }
  0x40   :  { %315 = vrot.lane.b32.xlu0 %v314_v31, %s455_s18 }
  0x76   :  { %v16_v32 = vpop.permute.xlu0 %15   ;;  %v36_v33 = vpop.permute.xlu1 %35  }
  0x77   :  { %18 = vst.msk [vmem:[#allocation0] ss:$8 sm:$0x3] %vm17_vm2, %v16_v32   ;;  %vm177_vm2 = vcmask 523744  }
  0x7a   :  { %v26_v34 = vpop.permute.xlu0 %25   ;;  %v46_v35 = vpop.permute.xlu1 %45  }
  0x7b   :  { %28 = vst.msk [vmem:[#allocation0] ss:$8 sm:$0x3] %vm27_vm3, %v26_v34   ;;  %vm187_vm3 = vcmask 490944  }
  0x7c   :  { %38 = vst.msk [vmem:[#allocation0] ss:$8 sm:$0x3] %vm37_vm4, %v36_v33   ;;  %vm197_vm4 = vcmask 458144  }
  0x7d   :  { %48 = vst.msk [vmem:[#allocation0] ss:$8 sm:$0x3] %vm47_vm5, %v46_v35   ;;  %vm207_vm5 = vcmask 425344  }
  0x7e   :  { %v56_v36 = vpop.permute.xlu0 %55   ;;  %v66_v37 = vpop.permute.xlu1 %65  }
  0x7f   :  { %58 = vst.msk [vmem:[#allocation0] ss:$8 sm:$0x3] %vm57_vm6, %v56_v36   ;;  %vm217_vm6 = vcmask 392544  }
  0x80   :  { %68 = vst.msk [vmem:[#allocation0] ss:$8 sm:$0x3] %vm67_vm7, %v66_v37   ;;  %vm227_vm7 = vcmask 359744  }
  0x82   :  { %v76_v38 = vpop.permute.xlu0 %75   ;;  %v86_v39 = vpop.permute.xlu1 %85  }
  0x83   :  { %78 = vst.msk [vmem:[#allocation0] ss:$8 sm:$0x3] %vm77_vm8, %v76_v38   ;;  %vm237_vm8 = vcmask 326944  }
  0x84   :  { %88 = vst.msk [vmem:[#allocation0] ss:$8 sm:$0x3] %vm87_vm9, %v86_v39   ;;  %vm247_vm9 = vcmask 294144  }
  0x86   :  { %v96_v40 = vpop.permute.xlu0 %95   ;;  %v106_v41 = vpop.permute.xlu1 %105  }
  0x87   :  { %98 = vst.msk [vmem:[#allocation0] ss:$8 sm:$0x3] %vm97_vm10, %v96_v40   ;;  %vm257_vm10 = vcmask 261344  }
  0x88   :  { %108 = vst.msk [vmem:[#allocation0] ss:$8 sm:$0x3] %vm107_vm11, %v106_v41   ;;  %vm267_vm11 = vcmask 228544  }
  0x8a   :  { %v116_v42 = vpop.permute.xlu0 %115   ;;  %v126_v43 = vpop.permute.xlu1 %125  }
  0x8b   :  { %118 = vst.msk [vmem:[#allocation0] ss:$8 sm:$0x3] %vm117_vm12, %v116_v42   ;;  %vm277_vm12 = vcmask 195744  }
  0x8c   :  { %128 = vst.msk [vmem:[#allocation0] ss:$8 sm:$0x3] %vm127_vm13, %v126_v43   ;;  %vm287_vm13 = vcmask 162944  }
  0x8e   :  { %v136_v44 = vpop.permute.xlu0 %135   ;;  %v146_v45 = vpop.permute.xlu1 %145  }
  0x8f   :  { %138 = vst.msk [vmem:[#allocation0] ss:$8 sm:$0x3] %vm137_vm14, %v136_v44   ;;  %vm297_vm14 = vcmask 130144  }
  0x90   :  { %148 = vst.msk [vmem:[#allocation0] ss:$8 sm:$0x3] %vm147_vm15, %v146_v45   ;;  %vm307_vm15 = vcmask 97344  }
  0x92   :  { %v156_v46 = vpop.permute.xlu0 %155   ;;  %v166_v47 = vpop.permute.xlu1 %165  }
  0x93   :  { %158 = vst.msk [vmem:[#allocation0] ss:$8 sm:$0x3] %vm157_vm0, %v156_v46   ;;  %vm317_vm0 = vcmask 64544  }
  0x94   :  { %168 = vst.msk [vmem:[#allocation0] ss:$8 sm:$0x3] %vm167_vm1, %v166_v47  }
  0x96   :  { %v176_v48 = vpop.permute.xlu0 %175   ;;  %v186_v49 = vpop.permute.xlu1 %185  }
  0x97   :  { %178 = vst.msk [vmem:[#allocation0] ss:$8 sm:$0x3] %vm177_vm2, %v176_v48  }
  0x98   :  { %188 = vst.msk [vmem:[#allocation0] ss:$8 sm:$0x3] %vm187_vm3, %v186_v49  }
  0x9a   :  { %v196_v50 = vpop.permute.xlu0 %195   ;;  %v206_v51 = vpop.permute.xlu1 %205  }
  0x9b   :  { %198 = vst.msk [vmem:[#allocation0] ss:$8 sm:$0x3] %vm197_vm4, %v196_v50  }
  0x9c   :  { %208 = vst.msk [vmem:[#allocation0] ss:$8 sm:$0x3] %vm207_vm5, %v206_v51  }
  0x9e   :  { %v216_v52 = vpop.permute.xlu0 %215   ;;  %v226_v53 = vpop.permute.xlu1 %225  }
  0x9f   :  { %218 = vst.msk [vmem:[#allocation0] ss:$8 sm:$0x3] %vm217_vm6, %v216_v52  }
  0xa0   :  { %228 = vst.msk [vmem:[#allocation0] ss:$8 sm:$0x3] %vm227_vm7, %v226_v53  }
  0xa2   :  { %v236_v54 = vpop.permute.xlu0 %235   ;;  %v246_v55 = vpop.permute.xlu1 %245  }
  0xa3   :  { %238 = vst.msk [vmem:[#allocation0] ss:$8 sm:$0x3] %vm237_vm8, %v236_v54  }
  0xa4   :  { %248 = vst.msk [vmem:[#allocation0] ss:$8 sm:$0x3] %vm247_vm9, %v246_v55  }
  0xa6   :  { %v256_v56 = vpop.permute.xlu0 %255   ;;  %v266_v57 = vpop.permute.xlu1 %265  }
  0xa7   :  { %258 = vst.msk [vmem:[#allocation0] ss:$8 sm:$0x3] %vm257_vm10, %v256_v56  }
  0xa8   :  { %268 = vst.msk [vmem:[#allocation0] ss:$8 sm:$0x3] %vm267_vm11, %v266_v57  }
  0xaa   :  { %v276_v58 = vpop.permute.xlu0 %275   ;;  %v286_v59 = vpop.permute.xlu1 %285  }
  0xab   :  { %278 = vst.msk [vmem:[#allocation0] ss:$8 sm:$0x3] %vm277_vm12, %v276_v58  }
  0xac   :  { %288 = vst.msk [vmem:[#allocation0] ss:$8 sm:$0x3] %vm287_vm13, %v286_v59  }
  0xae   :  { %v296_v60 = vpop.permute.xlu0 %295   ;;  %v306_v61 = vpop.permute.xlu1 %305  }
  0xaf   :  { %298 = vst.msk [vmem:[#allocation0] ss:$8 sm:$0x3] %vm297_vm14, %v296_v60  }
  0xb0   :  { %308 = vst.msk [vmem:[#allocation0] ss:$8 sm:$0x3] %vm307_vm15, %v306_v61  }
  0xb2   :  { %v316_v62 = vpop.permute.xlu0 %315  }
  0xb3   :  { %318 = vst.msk [vmem:[#allocation0] ss:$8 sm:$0x3] %vm317_vm0, %v316_v62  }
  0xba   :  { %v322_v63 = vld [vmem:[#allocation0] sm:$0x1]  ;;  %v326_v0 = vld [vmem:[#allocation0 + $0x8] sm:$0x1] }
  0xbb   :  { %324 = vst [vmem:[%s697_s1] sm:$0x1] %v322_v63  ;;  %393 = vst [vmem:[%s697_s1 + $0x1] sm:$0x1] %v326_v0 }

// kernel: upsample_forward.1
= control target key start
LH: loop header
LB: loop body
LE: loop exit
PB: predicated region body
PF: predicated region fallthrough
CT: control target
= control target key end

     0   :  { %s555_s12 = smov 0   ;;  %s783_s0 = inlined_call_operand.vmem [shape: f32[2,18,64], index: 0, kind: input, shape index: {}]   ;;  %s784_s1 = inlined_call_operand.vmem [shape: f32[256,256], index: 1, kind: input, shape index: {}]   ;;  %s785_s2 = inlined_call_operand.vmem [shape: f32[1,256], index: 2, kind: input, shape index: {}]   ;;  %s786_s3 = inlined_call_operand.vmem [shape: f32[2,16,256], index: 3, kind: output, shape index: {}]  }
   0x1 LB: > { %s402_s13 = sadd.s32 4294967295, %s532_s12   ;;  %p406_p0 = scmp.ge.s32.totalorder %s532_s12, 1  ;;  %s532_s12 = sphi %s555_s12, %s13_s12  }
   0x2   : > { %p137_p1 = scmp.lt.s32.totalorder %s532_s12, 3 }
   0x4   : > { %p138_p2 = pnand %p406_p0, %p137_p1 }
   0x5   : > { %p161_p3 = scmp.lt.s32.totalorder (!%p138_p2), %s402_s13, 1  ;;  %v191_v0 = vld [vmem:[%s784_s1 + $0x8] sm:$0xff] (!%p138_p2)  ;;  %v193_v1 = vld [vmem:[%s784_s1 + $0x18] sm:$0xff] (!%p138_p2)  ;;  %v190_v2 = vld [vmem:[%s784_s1] sm:$0xff] (!%p138_p2)  ;;  %s534_s25 = smov (!%p138_p2), 64   ;;  %vm185_vm0 = vcmask (!%p138_p2), 523264  }
   0x6   : > { %141 = sbr.rel (%p138_p2) target bundleno = 354 (0x162), region = 32  ;;  %v415_v3 = vpack.c.bf16 (!%p138_p2), %v193_v1, %v191_v0  ;;  %v192_v4 = vld [vmem:[%s784_s1 + $0x10] sm:$0xff] (!%p138_p2)  ;;  %v195_v5 = vld [vmem:[%s784_s1 + $0x28] sm:$0xff] (!%p138_p2)  ;;  %v197_v6 = vld [vmem:[%s784_s1 + $0x38] sm:$0xff] (!%p138_p2) }
   0x7   : > { %v417_v7 = vpack.c.bf16 (!%p138_p2), %v192_v4, %v190_v2  ;;  %v419_v8 = vpack.c.bf16 (!%p138_p2), %v197_v6, %v195_v5  ;;  %v194_v9 = vld [vmem:[%s784_s1 + $0x20] sm:$0xff] (!%p138_p2)  ;;  %v196_v10 = vld [vmem:[%s784_s1 + $0x30] sm:$0xff] (!%p138_p2)  ;;  %v199_v11 = vld [vmem:[%s784_s1 + $0x48] sm:$0xff] (!%p138_p2) }
   0x8   : > { %416 = vmatprep.subr.bf16.mxu0 (!%p138_p2), %v415_v3  ;;  %479 = vmatprep.subr.bf16.mxu1 (!%p138_p2), %v415_v3  ;;  %v201_v12 = vld [vmem:[%s784_s1 + $0x58] sm:$0xff] (!%p138_p2)  ;;  %v421_v13 = vpack.c.bf16 (!%p138_p2), %v196_v10, %v194_v9  ;;  %v198_v15 = vld [vmem:[%s784_s1 + $0x40] sm:$0xff] (!%p138_p2)  ;;  %v200_v16 = vld [vmem:[%s784_s1 + $0x50] sm:$0xff] (!%p138_p2) }
   0x9   : > { %418 = vmatpush1.bf16.msra.mxu0 (!%p138_p2), %v417_v7  ;;  %495 = vmatpush1.bf16.msra.mxu1 (!%p138_p2), %v417_v7  ;;  %v423_v14 = vpack.c.bf16 (!%p138_p2), %v201_v12, %v199_v11  ;;  %v203_v17 = vld [vmem:[%s784_s1 + $0x68] sm:$0xff] (!%p138_p2)  ;;  %v205_v18 = vld [vmem:[%s784_s1 + $0x78] sm:$0xff] (!%p138_p2)  ;;  %v425_v22 = vpack.c.bf16 (!%p138_p2), %v200_v16, %v198_v15  ;;  %v202_v24 = vld [vmem:[%s784_s1 + $0x60] sm:$0xff] (!%p138_p2) }
   0xa   : > { %420 = vmatprep.subr.bf16.mxu0 (!%p138_p2), %v419_v8  ;;  %480 = vmatprep.subr.bf16.mxu1 (!%p138_p2), %v419_v8  ;;  %v427_v23 = vpack.c.bf16 (!%p138_p2), %v205_v18, %v203_v17  ;;  %v204_v25 = vld [vmem:[%s784_s1 + $0x70] sm:$0xff] (!%p138_p2)  ;;  %v207_v26 = vld [vmem:[%s784_s1 + $0x88] sm:$0xff] (!%p138_p2)  ;;  %v209_v27 = vld [vmem:[%s784_s1 + $0x98] sm:$0xff] (!%p138_p2) }
   0xb   : > { %v429_v28 = vpack.c.bf16 (!%p138_p2), %v204_v25, %v202_v24  ;;  %v431_v29 = vpack.c.bf16 (!%p138_p2), %v209_v27, %v207_v26  ;;  %v206_v30 = vld [vmem:[%s784_s1 + $0x80] sm:$0xff] (!%p138_p2)  ;;  %v208_v31 = vld [vmem:[%s784_s1 + $0x90] sm:$0xff] (!%p138_p2)  ;;  %v211_v32 = vld [vmem:[%s784_s1 + $0xa8] sm:$0xff] (!%p138_p2) }
   0xc   : > { %v213_v33 = vld [vmem:[%s784_s1 + $0xb8] sm:$0xff] (!%p138_p2)  ;;  %v433_v34 = vpack.c.bf16 (!%p138_p2), %v208_v31, %v206_v30  ;;  %v210_v36 = vld [vmem:[%s784_s1 + $0xa0] sm:$0xff] (!%p138_p2)  ;;  %v212_v37 = vld [vmem:[%s784_s1 + $0xb0] sm:$0xff] (!%p138_p2) }
   0xd   : > { %s788_s13 = smov (!%p161_p3, %s402_s13), 1  ;;  %422 = vmatpush1.bf16.msra.mxu0 %v421_v13  ;;  %496 = vmatpush1.bf16.msra.mxu1 %v421_v13  ;;  %v435_v35 = vpack.c.bf16 %v213_v33, %v211_v32  ;;  %v215_v38 = vld [vmem:[%s784_s1 + $0xc8] sm:$0xff]  ;;  %v217_v39 = vld [vmem:[%s784_s1 + $0xd8] sm:$0xff]  ;;  %v437_v40 = vpack.c.bf16 %v212_v37, %v210_v36  ;;  %v214_v42 = vld [vmem:[%s784_s1 + $0xc0] sm:$0xff] }
   0xe   : > { %s511_s7 = smul.u32 24, %s788_s13  ;;  %424 = vmatprep.subr.bf16.mxu0 %v423_v14  ;;  %481 = vmatprep.subr.bf16.mxu1 %v423_v14  ;;  %v439_v41 = vpack.c.bf16 %v217_v39, %v215_v38  ;;  %v216_v43 = vld [vmem:[%s784_s1 + $0xd0] sm:$0xff]  ;;  %v219_v44 = vld [vmem:[%s784_s1 + $0xe8] sm:$0xff]  ;;  %v221_v45 = vld [vmem:[%s784_s1 + $0xf8] sm:$0xff]  ;;  %s414_s28 = sshll.u32 %s788_s13, 5 }
   0xf   : > { %v441_v48 = vpack.c.bf16 %v216_v43, %v214_v42  ;;  %v443_v49 = vpack.c.bf16 %v221_v45, %v219_v44  ;;  %v218_v50 = vld [vmem:[%s784_s1 + $0xe0] sm:$0xff]  ;;  %v220_v51 = vld [vmem:[%s784_s1 + $0xf0] sm:$0xff]  ;;  %v223_v52 = vld [vmem:[%s784_s1 + $0x108] sm:$0xff]  ;;  %v256_v44 = vlaneseq  ;;  %s170_s30 = scalar_lea.vmem %s786_s3, %s414_s28 }
  0x10   : > { %s605_s16 = scalar_lea.vmem %s783_s0, %s511_s7  ;;  %v225_v53 = vld [vmem:[%s784_s1 + $0x118] sm:$0xff]  ;;  %v445_v54 = vpack.c.bf16 %v220_v51, %v218_v50  ;;  %v222_v56 = vld [vmem:[%s784_s1 + $0x100] sm:$0xff]  ;;  %v224_v57 = vld [vmem:[%s784_s1 + $0x110] sm:$0xff] }
  0x11   : > { %v173_v19 = vld [vmem:[%s605_s16 + $0x1] sm:$0xff]  ;;  %v174_v20 = vld [vmem:[%s605_s16 + $0x9] sm:$0xff]  ;;  %426 = vmatpush1.bf16.msra.mxu0 %v425_v22  ;;  %497 = vmatpush1.bf16.msra.mxu1 %v425_v22  ;;  %v447_v55 = vpack.c.bf16 %v225_v53, %v223_v52  ;;  %v229_v59 = vld [vmem:[%s784_s1 + $0x138] sm:$0xff]  ;;  %v449_v60 = vpack.c.bf16 %v224_v57, %v222_v56  ;;  %v257_v45 = vshrl.u32 %v256_v44, 7 }
  0x12   : > { %v521_v21 = vpack.i.bf16 %v174_v20, %v173_v19  ;;  %428 = vmatprep.subr.bf16.mxu0 %v427_v23  ;;  %482 = vmatprep.subr.bf16.mxu1 %v427_v23  ;;  %v175_v46 = vld [vmem:[%s605_s16 + $0x2] sm:$0xff]  ;;  %v176_v47 = vld [vmem:[%s605_s16 + $0xa] sm:$0xff]  ;;  %v233_v1 = vld [vmem:[%s784_s1 + $0x158] sm:$0xff] }
  0x13   : > { %410 = vmatprep.mubr.msk.f32.mxu0 %vm185_vm0, %v175_v46  ;;  %411 = vmatprep.mubr.msk.f32.mxu1 %vm185_vm0, %v176_v47  ;;  %v227_v58 = vld [vmem:[%s784_s1 + $0x128] sm:$0xff]  ;;  %v226_v62 = vld [vmem:[%s784_s1 + $0x120] sm:$0xff]  ;;  %v228_v63 = vld [vmem:[%s784_s1 + $0x130] sm:$0xff]  ;;  %v258_v46 = vsub.s32 0, %v257_v45 }
  0x14   : > { %522 = vrot.lane.b32.xlu0 %v521_v21, %s534_s25  ;;  %v451_v61 = vpack.c.bf16 %v229_v59, %v227_v58  ;;  %v231_v0 = vld [vmem:[%s784_s1 + $0x148] sm:$0xff]  ;;  %v453_v2 = vpack.c.bf16 %v228_v63, %v226_v62  ;;  %v230_v4 = vld [vmem:[%s784_s1 + $0x140] sm:$0xff]  ;;  %v232_v5 = vld [vmem:[%s784_s1 + $0x150] sm:$0xff] }
  0x15   : > { %430 = vmatpush1.bf16.msra.mxu0 %v429_v28  ;;  %498 = vmatpush1.bf16.msra.mxu1 %v429_v28  ;;  %v455_v3 = vpack.c.bf16 %v233_v1, %v231_v0  ;;  %v235_v6 = vld [vmem:[%s784_s1 + $0x168] sm:$0xff]  ;;  %v237_v7 = vld [vmem:[%s784_s1 + $0x178] sm:$0xff]  ;;  %v457_v8 = vpack.c.bf16 %v232_v5, %v230_v4  ;;  %v234_v10 = vld [vmem:[%s784_s1 + $0x160] sm:$0xff] }
  0x16   : > { %432 = vmatprep.subr.bf16.mxu0 %v431_v29  ;;  %483 = vmatprep.subr.bf16.mxu1 %v431_v29  ;;  %v459_v9 = vpack.c.bf16 %v237_v7, %v235_v6  ;;  %v236_v11 = vld [vmem:[%s784_s1 + $0x170] sm:$0xff]  ;;  %v239_v12 = vld [vmem:[%s784_s1 + $0x188] sm:$0xff]  ;;  %v241_v13 = vld [vmem:[%s784_s1 + $0x198] sm:$0xff] }
  0x17   : > { %v461_v14 = vpack.c.bf16 %v236_v11, %v234_v10  ;;  %v463_v15 = vpack.c.bf16 %v241_v13, %v239_v12  ;;  %v238_v16 = vld [vmem:[%s784_s1 + $0x180] sm:$0xff]  ;;  %v240_v17 = vld [vmem:[%s784_s1 + $0x190] sm:$0xff]  ;;  %v243_v18 = vld [vmem:[%s784_s1 + $0x1a8] sm:$0xff] }
  0x18   : > { %v245_v19 = vld [vmem:[%s784_s1 + $0x1b8] sm:$0xff]  ;;  %v465_v20 = vpack.c.bf16 %v240_v17, %v238_v16  ;;  %v242_v22 = vld [vmem:[%s784_s1 + $0x1a0] sm:$0xff]  ;;  %v244_v23 = vld [vmem:[%s784_s1 + $0x1b0] sm:$0xff] }
  0x19   : > { %434 = vmatpush1.bf16.msra.mxu0 %v433_v34  ;;  %499 = vmatpush1.bf16.msra.mxu1 %v433_v34  ;;  %v467_v21 = vpack.c.bf16 %v245_v19, %v243_v18  ;;  %v247_v24 = vld [vmem:[%s784_s1 + $0x1c8] sm:$0xff]  ;;  %v249_v25 = vld [vmem:[%s784_s1 + $0x1d8] sm:$0xff]  ;;  %v469_v26 = vpack.c.bf16 %v244_v23, %v242_v22  ;;  %v246_v28 = vld [vmem:[%s784_s1 + $0x1c0] sm:$0xff] }
  0x1a   : > { %436 = vmatprep.subr.bf16.mxu0 %v435_v35  ;;  %484 = vmatprep.subr.bf16.mxu1 %v435_v35  ;;  %v471_v27 = vpack.c.bf16 %v249_v25, %v247_v24  ;;  %v248_v29 = vld [vmem:[%s784_s1 + $0x1d0] sm:$0xff]  ;;  %v251_v30 = vld [vmem:[%s784_s1 + $0x1e8] sm:$0xff]  ;;  %v253_v31 = vld [vmem:[%s784_s1 + $0x1f8] sm:$0xff] }
  0x1b   : > { %v473_v32 = vpack.c.bf16 %v248_v29, %v246_v28  ;;  %v475_v33 = vpack.c.bf16 %v253_v31, %v251_v30  ;;  %v250_v34 = vld [vmem:[%s784_s1 + $0x1e0] sm:$0xff]  ;;  %v252_v35 = vld [vmem:[%s784_s1 + $0x1f0] sm:$0xff]  ;;  %v172_v39 = vld [vmem:[%s605_s16 + $0x8] sm:$0xff] }
  0x1c   : > { %v477_v36 = vpack.c.bf16 %v252_v35, %v250_v34  ;;  %v171_v38 = vld [vmem:[%s605_s16] sm:$0xff] }
  0x1d   : > { %438 = vmatpush1.bf16.msra.mxu0 %v437_v40  ;;  %500 = vmatpush1.bf16.msra.mxu1 %v437_v40  ;;  %v254_v47 = vld [vmem:[%s785_s2] sm:$0x3] }
  0x1e   : > { %440 = vmatprep.subr.bf16.mxu0 %v439_v41  ;;  %485 = vmatprep.subr.bf16.mxu1 %v439_v41 }
  0x21   : > { %442 = vmatpush1.bf16.msra.mxu0 %v441_v48  ;;  %501 = vmatpush1.bf16.msra.mxu1 %v441_v48  ;;  %v262_v48 = vsub.s32 1, %v257_v45 }
  0x22   : > { %444 = vmatprep.subr.bf16.mxu0 %v443_v49  ;;  %486 = vmatprep.subr.bf16.mxu1 %v443_v49  ;;  %v259_v49 = vrot.slane %v254_v47, %v258_v46 }
  0x23   : > { %v263_v50 = vrot.slane %v254_v47, %v262_v48 }
  0x25   : > { %446 = vmatpush1.bf16.msra.mxu0 %v445_v54  ;;  %502 = vmatpush1.bf16.msra.mxu1 %v445_v54 }
  0x26   : > { %448 = vmatprep.subr.bf16.mxu0 %v447_v55  ;;  %487 = vmatprep.subr.bf16.mxu1 %v447_v55 }
  0x29   : > { %450 = vmatpush1.bf16.msra.mxu0 %v449_v60  ;;  %503 = vmatpush1.bf16.msra.mxu1 %v449_v60 }
  0x2a   : > { %452 = vmatprep.subr.bf16.mxu0 %v451_v61  ;;  %488 = vmatprep.subr.bf16.mxu1 %v451_v61 }
  0x2d   : > { %454 = vmatpush1.bf16.msra.mxu0 %v453_v2  ;;  %504 = vmatpush1.bf16.msra.mxu1 %v453_v2 }
  0x2e   : > { %456 = vmatprep.subr.bf16.mxu0 %v455_v3  ;;  %489 = vmatprep.subr.bf16.mxu1 %v455_v3 }
  0x31   : > { %458 = vmatpush1.bf16.msra.mxu0 %v457_v8  ;;  %505 = vmatpush1.bf16.msra.mxu1 %v457_v8 }
  0x32   : > { %460 = vmatprep.subr.bf16.mxu0 %v459_v9  ;;  %490 = vmatprep.subr.bf16.mxu1 %v459_v9 }
  0x35   : > { %462 = vmatpush1.bf16.msra.mxu0 %v461_v14  ;;  %506 = vmatpush1.bf16.msra.mxu1 %v461_v14 }
  0x36   : > { %464 = vmatprep.subr.bf16.mxu0 %v463_v15  ;;  %491 = vmatprep.subr.bf16.mxu1 %v463_v15 }
  0x39   : > { %466 = vmatpush1.bf16.msra.mxu0 %v465_v20  ;;  %507 = vmatpush1.bf16.msra.mxu1 %v465_v20 }
  0x3a   : > { %468 = vmatprep.subr.bf16.mxu0 %v467_v21  ;;  %492 = vmatprep.subr.bf16.mxu1 %v467_v21 }
  0x3d   : > { %470 = vmatpush1.bf16.msra.mxu0 %v469_v26  ;;  %508 = vmatpush1.bf16.msra.mxu1 %v469_v26 }
  0x3e   : > { %472 = vmatprep.subr.bf16.mxu0 %v471_v27  ;;  %493 = vmatprep.subr.bf16.mxu1 %v471_v27 }
  0x41   : > { %474 = vmatpush1.bf16.msra.mxu0 %v473_v32  ;;  %509 = vmatpush1.bf16.msra.mxu1 %v473_v32 }
  0x42   : > { %476 = vmatprep.subr.bf16.mxu0 %v475_v33  ;;  %494 = vmatprep.subr.bf16.mxu1 %v475_v33 }
  0x45   : > { %478 = vmatpush1.bf16.msra.mxu0 %v477_v36  ;;  %510 = vmatpush1.bf16.msra.mxu1 %v477_v36 }
  0x86   : > { %v523_v37 = vpop.permute.xlu0 %522 }
  0x87   : > { %v525_v40 = vunpack.i.h.bf16 %v523_v37  ;;  %v524_v41 = vunpack.i.l.bf16 %v523_v37 }
  0x89   : > { %v186_v42 = vsel %vm185_vm0, %v171_v38, %v524_v41  ;;  %v187_v43 = vsel %vm185_vm0, %v172_v39, %v525_v40 }
  0x8a   : > { %331 = vmatmul.mubr.f32.vlgmr.msra.gmra.mrb[0].mxu0 %v186_v42  ;;  %337 = vmatmul.mubr.f32.vlgmr.msra.gmra.mrb[0].mxu1 %v187_v43 }
 0x15d   : > { %v332_v51 = vpop.f32.mrb[0].mxu0  ;;  %v338_v52 = vpop.f32.mrb[0].mxu1 }
 0x15e   : > { %v333_v53 = vadd.f32 %v332_v51, %v259_v49  ;;  %v339_v54 = vadd.f32 %v338_v52, %v259_v49  ;;  %v334_v55 = vpop.f32.mrb[1].mxu0  ;;  %v340_v56 = vpop.f32.mrb[1].mxu1 }
 0x15f   : > { %v335_v57 = vadd.f32 %v334_v55, %v263_v50  ;;  %v341_v58 = vadd.f32 %v340_v56, %v263_v50 }
 0x160   : > { %343 = vst [vmem:[%s170_s30] sm:$0xff] %v333_v53  ;;  %345 = vst [vmem:[%s170_s30 + $0x10] sm:$0xff] %v339_v54 }
 0x161   : > { %344 = vst [vmem:[%s170_s30 + $0x8] sm:$0xff] %v335_v57  ;;  %346 = vst [vmem:[%s170_s30 + $0x18] sm:$0xff] %v341_v58 }
 0x162 PF: > { %s13_s12 = sadd.s32 1, %s532_s12  }
 0x163   : > { %p10_p4 = scmp.ge.s32.totalorder %s13_s12, 4  }
 0x165   :  { %12 = sbr.rel (!%p10_p4) target bundleno = 1 (0x1), region = 62 }

</bundles_post_ra>
